<compile_context>
chip_gen: v7x
topology: tpu7x:2x2x1
jax: 0.10.0
libtpu: 0.0.40
codegen_flags: <defaults>
</compile_context>

<pallas_src>
import functools

import jax
import jax.numpy as jnp
from jax.experimental import pallas as pl
from jax.experimental.pallas import tpu as pltpu

_INV_LN2 = 1.4426950408889634          # 1 / ln(2): log2(x) = log(x) * _INV_LN2
_TARGET_TILE_BYTES = 8 * 1024 * 1024   # ~8 MiB input tiles sit at the HBM plateau
_MIB = 1024 * 1024


def _round_up(v, m):
    return -(-v // m) * m


@functools.lru_cache(maxsize=None)
def _vmem_capacity_bytes():
    """Physical VMEM per TensorCore (v5e/v6e: 128 MiB, v7x: 64 MiB)."""
    try:
        return int(pltpu.get_tpu_info().vmem_capacity_bytes)
    except Exception:
        return 64 * _MIB  # conservative (v7x-sized) fallback


def _row_align(itemsize):
    # Sublane packing granule: 8 rows for f32, 16 for bf16, 32 for 8-bit types.
    return max(8, (8 * 4) // itemsize)


def _choose_row_tile(n, c, itemsize):
    """Pick the row tile by bytes: ~8 MiB input tiles, VMEM-budget aware."""
    vmem_cap = _vmem_capacity_bytes()
    # ~60% of physical VMEM for this kernel's scoped allocations, capped so the
    # 128 MiB parts don't go overboard.
    budget = min((vmem_cap * 3) // 5, 80 * _MIB)

    padded_c = _round_up(c, 128)                 # lane padding of the real VMEM tile
    align = _row_align(itemsize)
    in_row_bytes = padded_c * itemsize
    # f32 intermediates (x_f32, e, e*shifted) spill to VMEM for big tiles.
    per_row_total = 2 * in_row_bytes + 3 * padded_c * 4

    rows_by_budget = max(align, (budget - 2 * _MIB) // per_row_total)
    rows_by_target = max(align, _TARGET_TILE_BYTES // in_row_bytes)
    tn = min(rows_by_budget, rows_by_target, _round_up(n, align))
    tn = max(align, (tn // align) * align)

    # v7x (2 TensorCores/chip): give the "parallel" row axis >= 2 steps so both
    # cores stream rows. Skip on single-core 128 MiB parts and tiny batches.
    if vmem_cap <= 96 * _MIB and -(-n // tn) == 1 and n > 2 * align:
        tn = max(align, _round_up(-(-n // 2), align))

    # TODO(synk): for LLM-vocab sized C where even `align` rows exceed the VMEM
    # budget, add a second "arbitrary" grid axis over C with an online
    # max/sum accumulator (flash-softmax style) instead of loading whole rows.
    return tn, padded_c


def _entropy_softmax_kernel(x_ref, o_ref):
    # Numerically-stable softmax entropy over the class (lane) axis:
    #   entropy = -sum(p * log p) = log(s) - sum(e * shifted) / s
    x = x_ref[...].astype(jnp.float32)                # cast in-kernel; DMA stays narrow
    m = jnp.max(x, axis=1, keepdims=True)             # (tn, 1) cross-lane reduce (XLU)
    shifted = x - m
    e = jnp.exp(shifted)                              # EUP
    s = jnp.sum(e, axis=1, keepdims=True)             # (tn, 1)
    se = jnp.sum(e * shifted, axis=1, keepdims=True)  # (tn, 1)
    ent = jnp.log(s) - se / s                         # both terms >= 0: no cancellation
    o_ref[...] = ent.astype(o_ref.dtype)


def _entropy_plain_kernel(x_ref, o_ref):
    # applySoftMax=False branch: -sum(x * log2(x), dim=1).
    # (Like PyTorch, exact zeros in x give NaN via 0 * log2(0).)
    x = x_ref[...].astype(jnp.float32)
    ent = -jnp.sum(x * (jnp.log(x) * jnp.float32(_INV_LN2)), axis=1, keepdims=True)
    o_ref[...] = ent.astype(o_ref.dtype)


@functools.partial(jax.jit, static_argnames=("apply_softmax", "row_tile"))
def entropy_loss(x, apply_softmax=True, row_tile=None):
    """Pallas implementation of EntropyLoss.forward for 2-D input (N, C).

    Pass logits in their native dtype (e.g. bf16): the kernel is HBM-bound and
    casts to f32 only once the tile is resident in VMEM. `row_tile` is an
    optional static override of the row-tile size (testing / tuning).
    Returned entropies are cast back to x.dtype to match the PyTorch module
    (consider keeping f32 logits if downstream code sorts near-ties).
    """
    N, C = x.shape
    itemsize = jnp.dtype(x.dtype).itemsize

    tn, padded_c = _choose_row_tile(N, C, itemsize)
    if row_tile is not None:
        align = _row_align(itemsize)
        tn = max(align, _round_up(int(row_tile), align))

    grid_steps = pl.cdiv(N, tn)
    kernel = _entropy_softmax_kernel if apply_softmax else _entropy_plain_kernel

    # Scoped-VMEM accounting: double-buffered input tiles + f32 intermediates
    # + double-buffered (tn, 1) output.
    tile_in_bytes = tn * padded_c * itemsize
    interm_bytes = 3 * tn * padded_c * 4
    scoped_bytes = 2 * tile_in_bytes + interm_bytes + 2 * tn * 4
    vmem_cap = _vmem_capacity_bytes()
    vmem_limit = int(min(vmem_cap - 8 * _MIB,
                         max(32 * _MIB, scoped_bytes + 4 * _MIB)))

    # Small tiles with many steps: deepen the input pipeline to hide the fixed
    # ~0.35 us per-step cost. (With byte-based tiling this rarely triggers.)
    if tile_in_bytes < _MIB and grid_steps >= 4:
        in_spec = pl.BlockSpec((tn, C), lambda i: (i, 0),
                               pipeline_mode=pl.Buffered(3))
    else:
        in_spec = pl.BlockSpec((tn, C), lambda i: (i, 0))

    out = pl.pallas_call(
        kernel,
        out_shape=jax.ShapeDtypeStruct((N, 1), jnp.float32),
        grid_spec=pl.GridSpec(
            grid=(grid_steps,),
            in_specs=[in_spec],
            out_specs=pl.BlockSpec((tn, 1), lambda i: (i, 0)),
        ),
        compiler_params=pltpu.CompilerParams(
            dimension_semantics=("parallel",),
            vmem_limit_bytes=vmem_limit,
        ),
        cost_estimate=pl.CostEstimate(
            flops=6 * N * C,
            transcendentals=N * C,
            bytes_accessed=N * C * itemsize + N * 4,
        ),
    )(x)

    # Match the PyTorch module: entropies come back in the input dtype.
    return out[:, 0].astype(x.dtype)


def _entropy_ref(x, apply_softmax=True):
    """Pure-JAX reference matching the PyTorch module."""
    x = x.astype(jnp.float32)
    if apply_softmax:
        ent = jax.nn.softmax(x, axis=1) * jax.nn.log_softmax(x, axis=1)
    else:
        ent = x * (jnp.log(x) / jnp.log(2.0))
    return -jnp.sum(ent, axis=1)


if __name__ == "__main__":
    key = jax.random.PRNGKey(0)
    N, C = 8, 32  # small logits matrix: batch=8, num_classes=32
    x = jax.random.normal(key, (N, C), dtype=jnp.float32)

    # applySoftMax=True path (default in the module).
    ent = entropy_loss(x, apply_softmax=True)
    jax.block_until_ready(ent)
    ref = _entropy_ref(x, apply_softmax=True)
    assert ent.shape == (N,)
    assert jnp.allclose(ent, ref, atol=1e-5, rtol=1e-5), (ent, ref)

    # applySoftMax=False path (requires strictly positive input, e.g. probabilities).
    probs = jax.nn.softmax(jax.random.normal(jax.random.PRNGKey(1), (N, C)), axis=1)
    ent2 = entropy_loss(probs, apply_softmax=False)
    jax.block_until_ready(ent2)
    ref2 = _entropy_ref(probs, apply_softmax=False)
    assert jnp.allclose(ent2, ref2, atol=1e-5, rtol=1e-5), (ent2, ref2)

    # Ragged N (not a multiple of 8) with a forced multi-step grid: exercises
    # the boundary-block masking that replaced the concatenate padding.
    x3 = jax.random.normal(jax.random.PRNGKey(2), (13, C), dtype=jnp.float32)
    ent3 = entropy_loss(x3, apply_softmax=True, row_tile=8)
    jax.block_until_ready(ent3)
    ref3 = _entropy_ref(x3, apply_softmax=True)
    assert ent3.shape == (13,)
    assert jnp.allclose(ent3, ref3, atol=1e-5, rtol=1e-5), (ent3, ref3)

    # bf16 logits: narrow HBM traffic, 16-row sublane alignment, boundary block.
    x4 = jax.random.normal(jax.random.PRNGKey(3), (20, C)).astype(jnp.bfloat16)
    ent4 = entropy_loss(x4, apply_softmax=True)
    jax.block_until_ready(ent4)
    ref4 = _entropy_ref(x4, apply_softmax=True)
    assert ent4.shape == (20,) and ent4.dtype == jnp.bfloat16
    assert jnp.allclose(ent4.astype(jnp.float32), ref4, atol=3e-2, rtol=3e-2), (ent4, ref4)

    print("KERNEL_OK")
</pallas_src>

<mosaic_0001>
module attributes {stable_mosaic.version = 11 : i64} {
  func.func @_entropy_softmax_kernel(%arg0: i32, %arg1: memref<8x32xf32, #tpu.memory_space<vmem>>, %arg2: memref<8x1xf32, #tpu.memory_space<vmem>>) attributes {dimension_semantics = [#tpu.dimension_semantics<parallel>], iteration_bounds = array<i64: 1>, scalar_prefetch = 0 : i64, scratch_operands = 0 : i64, tpu.core_type = #tpu.core_type<tc>, window_params = [{transform_indices = @transform_0, window_bounds = array<i64: 8, 32>}, {transform_indices = @transform_1, window_bounds = array<i64: 8, 1>}]} {
    %c0 = arith.constant 0 : index
    %c0_0 = arith.constant 0 : index
    %0 = vector.load %arg1[%c0, %c0_0] : memref<8x32xf32, #tpu.memory_space<vmem>>, vector<8x32xf32>
    %cst = arith.constant dense<0xFF800000> : vector<8xf32>
    %1 = vector.multi_reduction <maximumf>, %0, %cst [1] : vector<8x32xf32> to vector<8xf32>
    %2 = vector.shape_cast %1 : vector<8xf32> to vector<8x1xf32>
    %3 = vector.broadcast %2 : vector<8x1xf32> to vector<8x32xf32>
    %4 = arith.subf %0, %3 : vector<8x32xf32>
    %5 = math.exp %4 : vector<8x32xf32>
    %cst_1 = arith.constant dense<0.000000e+00> : vector<8xf32>
    %6 = vector.multi_reduction <add>, %5, %cst_1 [1] : vector<8x32xf32> to vector<8xf32>
    %7 = vector.shape_cast %6 : vector<8xf32> to vector<8x1xf32>
    %8 = arith.mulf %5, %4 : vector<8x32xf32>
    %cst_2 = arith.constant dense<0.000000e+00> : vector<8xf32>
    %9 = vector.multi_reduction <add>, %8, %cst_2 [1] : vector<8x32xf32> to vector<8xf32>
    %10 = vector.shape_cast %9 : vector<8xf32> to vector<8x1xf32>
    %11 = math.log %7 : vector<8x1xf32>
    %12 = arith.divf %10, %7 : vector<8x1xf32>
    %13 = arith.subf %11, %12 : vector<8x1xf32>
    %c0_3 = arith.constant 0 : index
    %c0_4 = arith.constant 0 : index
    %14 = vector.load %arg2[%c0_3, %c0_4] : memref<8x1xf32, #tpu.memory_space<vmem>>, vector<8x1xf32>
    tpu.vector_store %arg2[%c0_3, %c0_4], %13 {strides = array<i32>} : memref<8x1xf32, #tpu.memory_space<vmem>>, vector<8x1xf32>,
    return
  }
  func.func @transform_0(%arg0: i32) -> (i32, i32) {
    %c0_i32 = arith.constant 0 : i32
    %c0_i32_0 = arith.constant 0 : i32
    return %arg0, %c0_i32 : i32, i32
  }
  func.func @transform_1(%arg0: i32) -> (i32, i32) {
    %c0_i32 = arith.constant 0 : i32
    %c0_i32_0 = arith.constant 0 : i32
    return %arg0, %c0_i32 : i32, i32
  }
}

</mosaic_0001>

<bundles_post_ra>
// kernel: entropy_loss.1
= control target key start
LH: loop header
LB: loop body
LE: loop exit
PB: predicated region body
PF: predicated region fallthrough
CT: control target
= control target key end

     0   :  { %6 = vsyncpa [#allocation3], 0  ;;  %s78_s6 = smov [#allocation2]   ;;  %s104_s0 = inlined_call_operand.hbm [shape: f32[8,32], index: 0, kind: input, shape index: {}]   ;;  %s105_s1 = inlined_call_operand.vmem [shape: f32[8,1], index: 1, kind: output, shape index: {}]  }
   0x1   :  { %s13_s7 = sshll.u32 %s78_s6, 4  ;;  %s54_s10 = scalar_lea.hbm %s104_s0, 128  ;;  %s14_s7 = int_to_ptr.vmem [resolvable:$true] %s13_s7 }
   0x2   :  { %p55_p0 = scmp.ne.s32.totalorder %s104_s0, %s54_s10  ;;  %p58_p1 = scmp.lt.u32.totalorder %s54_s10, %s104_s0 }
   0x4   :  { %p60_p2 = pnand %p58_p1, %p55_p0 }
   0x6   :  { %63 = shalt.err (!%p60_p2)
}
   0x7   :  { %s64_s15 = scalar_lea.vmem %s14_s7, 128  ;;  %p69_p4 = scmp.lt.s32.totalorder %s14_s7, %s14_s7 }
   0x8   :  { %p65_p3 = scmp.ne.s32.totalorder %s14_s7, %s64_s15  ;;  %p70_p5 = scmp.lt.s32.totalorder %s64_s15, %s64_s15 }
   0xa   :  { %p71_p6 = por %p70_p5, %p69_p4 }
   0xc   :  { %p72_p7 = pnand %p71_p6, %p65_p3 }
   0xe   :  { %75 = shalt.err (!%p72_p7)
}
   0xf   :  { %16 = dma.hbm_to_vmem [thread:$0]  %s104_s0, 128, %s14_s7, [#allocation3]  }
  0x10   :  { %76 = dma.done.wait [#allocation3], 128  }
  0x11   :  { %77 = vsyncadd [#allocation3], 4294967168  ;;  %vm21_vm0 = vcmask 261120   ;;  %v20_v0 = vld [vmem:[#allocation2] sm:$0xff]  ;;  %vm40_vm1 = vcmask 7168  }
  0x12   :  { %v22_v1 = vsel %vm21_vm0, %v20_v0, -inf }
  0x13   :  { %23 = vmax.xlane.f32.xlu0 %v22_v1 }
  0xa0   :  { %v24_v2 = vpop.xlane.xlu0 %23 }
  0xa1   :  { %v25_v3 = vsub.f32 %v20_v0, %v24_v2 }
  0xa3   :  { %v26_v4 = vmul.f32 1.442695, %v25_v3 }
  0xa5   :  { %48 = vpow2.f32 %v26_v4 }
  0xaf   :  { %v49_v5 = vpop.eup %48 }
  0xb0   :  { %v28_v6 = vsel %vm21_vm0, %v49_v5, 0.0  ;;  %v31_v7 = vmul.f32 %v49_v5, %v25_v3 }
  0xb1   :  { %29 = vadd.xlane.f32.xlu0 %v28_v6 }
  0xb2   :  { %v32_v8 = vsel %vm21_vm0, %v31_v7, 0.0 }
  0xb3   :  { %33 = vadd.xlane.f32.xlu1 %v32_v8 }
 0x13e   :  { %v30_v9 = vpop.xlane.xlu0 %29 }
 0x13f   :  { %50 = vlog2.f32 %v30_v9 }
 0x140   :  { %52 = vrcp.f32 %v30_v9  ;;  %v34_v13 = vpop.xlane.xlu1 %33 }
 0x149   :  { %v51_v10 = vpop.eup %50 }
 0x14a   :  { %v53_v11 = vpop.eup %52  ;;  %v36_v12 = vmul.f32 0.6931472, %v51_v10 }
 0x14b   :  { %v38_v14 = vmul.f32 %v53_v11, %v34_v13 }
 0x14d   :  { %v39_v15 = vsub.f32 %v36_v12, %v38_v14 }
 0x14f   :  { %41 = vst.msk [vmem:[%s105_s1] sm:$0xff] %vm40_vm1, %v39_v15 }
 0x150   :  { %46 = vsyncpa [#allocation3], 1 }

</bundles_post_ra>
